<compile_context>
chip_gen: v7x
topology: tpu7x:2x2x1
jax: 0.10.0
libtpu: 0.0.40
codegen_flags: <defaults>
</compile_context>

<pallas_src>
import functools

import jax
import jax.numpy as jnp
from jax.experimental import pallas as pl
from jax.experimental.pallas import tpu as pltpu

LANES = 128
DEFAULT_BLOCK_ROWS = 1024  # sweepable; 512-2048 all fit comfortably in VMEM


def _int_pow(s, gi):
    if gi <= 0:
        return jnp.ones_like(s)
    w = s
    for _ in range(gi - 1):
        w = w * s
    return w


def _rsum(v):
    # (block_rows, 128) -> (8, 128): layout-preserving reshape + VALU vreg adds.
    return jnp.sum(v.reshape(-1, 8, LANES), axis=0)


def _mixed_loss_kernel(x_ref, t_ref, focal_ref, inter_ref, pt_ref,
                       *, gamma, n_valid, bps, block_rows, pad, binary_targets):
    c = pl.program_id(0)      # split (parallel) axis -> one accumulator per split
    i = pl.program_id(1)      # row-block (reduction) axis

    @pl.when(i == 0)
    def _():
        focal_ref[...] = jnp.zeros_like(focal_ref)
        inter_ref[...] = jnp.zeros_like(inter_ref)
        pt_ref[...] = jnp.zeros_like(pt_ref)

    x = x_ref[...].astype(jnp.float32)
    t = t_ref[...].astype(jnp.float32)

    # ---- shared pieces: one exp + one log per element ----
    e = jnp.exp(-jnp.abs(x))                 # exp(-|x|)            (EUP)
    ope = 1.0 + e                            # 1 + exp(-|x|)
    log_ope = jnp.log(ope)                   # == log1p(e), exact   (EUP)
    r = 1.0 / ope
    er = e * r
    pos = x >= 0.0
    p = jnp.where(pos, r, er)                # sigmoid(x), exact both tails
    q = jnp.where(pos, er, r)                # sigmoid(-x) == 1 - p

    # ---- stable BCE-with-logits: max(x,0) - x*t + log(1+exp(-|x|)) ----
    bce = jnp.maximum(x, 0.0) - x * t + log_ope

    # ---- focal weight: sigmoid(-x*(2t-1))**gamma ----
    g = float(gamma)
    if binary_targets and g.is_integer() and 0.0 <= g <= 16.0:
        # binary {0,1} targets: sigmoid(-x*(2t-1)) == (t>0.5 ? 1-p : p);
        # integer gamma -> plain multiplies (one mul for gamma=2), no extra EUP.
        s = jnp.where(t > 0.5, q, p)
        w = _int_pow(s, int(g))
    else:
        # generic fallback: exact for arbitrary target values / non-integer gamma
        z = -x * (t * 2.0 - 1.0)
        logsig = jnp.minimum(z, 0.0) - jnp.log1p(jnp.exp(-jnp.abs(z)))
        w = jnp.exp(logsig * g)

    focal_elem = w * bce

    focal_ref[...] += _rsum(focal_elem)
    inter_ref[...] += _rsum(p * t)
    pt_ref[...] += _rsum(p + t)

    if pad > 0:
        # Subtract contributions of padded (zero) elements.  Only the trailing
        # block(s) that actually overlap the padded tail take this branch; the
        # steady-state loop carries no mask work.  In the pad x == 0 and
        # t == 0, so inter (p*t) is already correct and pt only needs p removed.
        gb = c * bps + i
        block_elems = block_rows * LANES
        # NOTE: int32 index math; valid for inputs < 2**31 elements.

        @pl.when((gb + 1) * block_elems > n_valid)
        def _():
            row = jax.lax.broadcasted_iota(jnp.int32, x.shape, 0)
            lane = jax.lax.broadcasted_iota(jnp.int32, x.shape, 1)
            flat = gb * block_elems + row * LANES + lane
            padm = (flat >= n_valid).astype(jnp.float32)
            focal_ref[...] -= _rsum(focal_elem * padm)
            pt_ref[...] -= _rsum(p * padm)


def mixed_loss(x, target, *, alpha, gamma,
               block_rows=DEFAULT_BLOCK_ROWS, binary_targets=True):
    """Pallas implementation of MixedLoss.forward."""
    # Mirror the PyTorch module's target.squeeze(1) tolerance.
    if target.shape != x.shape and target.ndim == x.ndim + 1 and target.shape[1] == 1:
        target = jnp.squeeze(target, axis=1)
    assert x.shape == target.shape, "target size must match input size"

    n = int(x.size)
    rows = pl.cdiv(n, LANES)
    block_rows = min(int(block_rows), ((rows + 7) // 8) * 8)
    total_blocks = pl.cdiv(rows, block_rows)
    num_splits = 2 if total_blocks >= 2 else 1      # v7x: one block range per TC
    bps = pl.cdiv(total_blocks, num_splits)
    rows_p = num_splits * bps * block_rows
    pad = rows_p * LANES - n

    # Keep native dtype (kernel casts to f32); only pad when actually needed.
    xf = x.reshape(-1)
    tf = target.reshape(-1)
    if pad:
        xf = jnp.pad(xf, (0, pad))
        tf = jnp.pad(tf, (0, pad))
    xf = xf.reshape(rows_p, LANES)
    tf = tf.reshape(rows_p, LANES)

    kernel = functools.partial(
        _mixed_loss_kernel,
        gamma=float(gamma), n_valid=n, bps=int(bps),
        block_rows=int(block_rows), pad=int(pad),
        binary_targets=bool(binary_targets))

    in_spec = pl.BlockSpec((block_rows, LANES), lambda c, i: (c * bps + i, 0))
    acc_spec = pl.BlockSpec((8, LANES), lambda c, i: (c, 0))
    acc_shape = jax.ShapeDtypeStruct((num_splits * 8, LANES), jnp.float32)

    focal_p, inter_p, pt_p = pl.pallas_call(
        kernel,
        out_shape=(acc_shape, acc_shape, acc_shape),
        grid_spec=pltpu.PrefetchScalarGridSpec(
            num_scalar_prefetch=0,
            grid=(num_splits, bps),
            in_specs=[in_spec, in_spec],
            out_specs=[acc_spec, acc_spec, acc_spec],
        ),
        compiler_params=pltpu.CompilerParams(
            dimension_semantics=("parallel", "arbitrary")),
    )(xf, tf)

    # Final (tiny) scalar math in the wrapper: combine per-split partial sums.
    focal_mean = jnp.sum(focal_p) / jnp.float32(n)
    smooth = jnp.float32(1.0)
    dice = (2.0 * jnp.sum(inter_p) + smooth) / (jnp.sum(pt_p) + smooth)
    return alpha * focal_mean - jnp.log(dice)


def _mixed_loss_ref(x, t, alpha, gamma):
    x = x.astype(jnp.float32)
    t = t.astype(jnp.float32)
    max_val = jnp.maximum(-x, 0.0)
    loss = x - x * t + max_val + jnp.log(jnp.exp(-max_val) + jnp.exp(-x - max_val))
    invprobs = jax.nn.log_sigmoid(-x * (t * 2.0 - 1.0))
    focal = jnp.mean(jnp.exp(invprobs * gamma) * loss)
    p = jax.nn.sigmoid(x)
    dice = (2.0 * jnp.sum(p * t) + 1.0) / (jnp.sum(p) + jnp.sum(t) + 1.0)
    return alpha * focal - jnp.log(dice)


if __name__ == "__main__":
    ALPHA, GAMMA = 10.0, 2.0  # deterministic hyper-params (module __init__ args)
    key = jax.random.PRNGKey(0)
    kx, kt = jax.random.split(key)
    # input: logits [N, C, H, W]; target: binary mask of same shape
    x = jax.random.normal(kx, (2, 4, 16, 16), dtype=jnp.float32)
    target = (jax.random.uniform(kt, (2, 4, 16, 16)) > 0.5).astype(jnp.float32)

    out = mixed_loss(x, target, alpha=ALPHA, gamma=GAMMA)
    out = jax.block_until_ready(out)

    ref = _mixed_loss_ref(x, target, ALPHA, GAMMA)
    assert jnp.allclose(out, ref, rtol=1e-5, atol=1e-5), (out, ref)
    print("KERNEL_OK")
</pallas_src>

<mosaic_0001>
module attributes {stable_mosaic.version = 11 : i64} {
  func.func @_mixed_loss_kernel(%arg0: i32, %arg1: i32, %arg2: memref<16x128xf32, #tpu.memory_space<vmem>>, %arg3: memref<16x128xf32, #tpu.memory_space<vmem>>, %arg4: memref<8x128xf32, #tpu.memory_space<vmem>>, %arg5: memref<8x128xf32, #tpu.memory_space<vmem>>, %arg6: memref<8x128xf32, #tpu.memory_space<vmem>>) attributes {dimension_semantics = [#tpu.dimension_semantics<parallel>, #tpu.dimension_semantics<arbitrary>], iteration_bounds = array<i64: 1, 1>, scalar_prefetch = 0 : i64, scratch_operands = 0 : i64, tpu.core_type = #tpu.core_type<tc>, window_params = [{transform_indices = @transform_0, window_bounds = array<i64: 16, 128>}, {transform_indices = @transform_1, window_bounds = array<i64: 16, 128>}, {transform_indices = @transform_2, window_bounds = array<i64: 8, 128>}, {transform_indices = @transform_3, window_bounds = array<i64: 8, 128>}, {transform_indices = @transform_4, window_bounds = array<i64: 8, 128>}]} {
    %c0_i32 = arith.constant 0 : i32
    %0 = arith.cmpi eq, %arg1, %c0_i32 : i32
    %1 = arith.extui %0 : i1 to i32
    %c0_i32_0 = arith.constant 0 : i32
    %2 = arith.cmpi ne, %1, %c0_i32_0 : i32
    scf.if %2 {
      %cst_24 = arith.constant 0.000000e+00 : f32
      %46 = vector.broadcast %cst_24 : f32 to vector<8x128xf32>
      %c0_25 = arith.constant 0 : index
      %c0_26 = arith.constant 0 : index
      %47 = vector.load %arg4[%c0_25, %c0_26] : memref<8x128xf32, #tpu.memory_space<vmem>>, vector<8x128xf32>
      tpu.vector_store %arg4[%c0_25, %c0_26], %46 {strides = array<i32>} : memref<8x128xf32, #tpu.memory_space<vmem>>, vector<8x128xf32>,
      %cst_27 = arith.constant 0.000000e+00 : f32
      %48 = vector.broadcast %cst_27 : f32 to vector<8x128xf32>
      %c0_28 = arith.constant 0 : index
      %c0_29 = arith.constant 0 : index
      %49 = vector.load %arg5[%c0_28, %c0_29] : memref<8x128xf32, #tpu.memory_space<vmem>>, vector<8x128xf32>
      tpu.vector_store %arg5[%c0_28, %c0_29], %48 {strides = array<i32>} : memref<8x128xf32, #tpu.memory_space<vmem>>, vector<8x128xf32>,
      %cst_30 = arith.constant 0.000000e+00 : f32
      %50 = vector.broadcast %cst_30 : f32 to vector<8x128xf32>
      %c0_31 = arith.constant 0 : index
      %c0_32 = arith.constant 0 : index
      %51 = vector.load %arg6[%c0_31, %c0_32] : memref<8x128xf32, #tpu.memory_space<vmem>>, vector<8x128xf32>
      tpu.vector_store %arg6[%c0_31, %c0_32], %50 {strides = array<i32>} : memref<8x128xf32, #tpu.memory_space<vmem>>, vector<8x128xf32>,
    } else {
    }
    %c0 = arith.constant 0 : index
    %c0_1 = arith.constant 0 : index
    %3 = vector.load %arg2[%c0, %c0_1] : memref<16x128xf32, #tpu.memory_space<vmem>>, vector<16x128xf32>
    %c0_2 = arith.constant 0 : index
    %c0_3 = arith.constant 0 : index
    %4 = vector.load %arg3[%c0_2, %c0_3] : memref<16x128xf32, #tpu.memory_space<vmem>>, vector<16x128xf32>
    %5 = math.absf %3 : vector<16x128xf32>
    %cst = arith.constant 0.000000e+00 : f32
    %6 = vector.broadcast %cst : f32 to vector<16x128xf32>
    %7 = arith.subf %6, %5 : vector<16x128xf32>
    %8 = math.exp %7 : vector<16x128xf32>
    %cst_4 = arith.constant 1.000000e+00 : f32
    %9 = vector.broadcast %cst_4 : f32 to vector<16x128xf32>
    %10 = arith.addf %9, %8 : vector<16x128xf32>
    %11 = math.log %10 : vector<16x128xf32>
    %cst_5 = arith.constant 1.000000e+00 : f32
    %12 = vector.broadcast %cst_5 : f32 to vector<16x128xf32>
    %13 = arith.divf %12, %10 : vector<16x128xf32>
    %14 = arith.mulf %8, %13 : vector<16x128xf32>
    %cst_6 = arith.constant 0.000000e+00 : f32
    %15 = vector.broadcast %cst_6 : f32 to vector<16x128xf32>
    %16 = arith.cmpf oge, %3, %15 : vector<16x128xf32>
    %17 = arith.select %16, %13, %14 : vector<16x128xi1>, vector<16x128xf32>
    %18 = arith.select %16, %14, %13 : vector<16x128xi1>, vector<16x128xf32>
    %cst_7 = arith.constant 0.000000e+00 : f32
    %19 = vector.broadcast %cst_7 : f32 to vector<16x128xf32>
    %20 = arith.maximumf %3, %19 : vector<16x128xf32>
    %21 = arith.mulf %3, %4 : vector<16x128xf32>
    %22 = arith.subf %20, %21 : vector<16x128xf32>
    %23 = arith.addf %22, %11 : vector<16x128xf32>
    %cst_8 = arith.constant 5.000000e-01 : f32
    %24 = vector.broadcast %cst_8 : f32 to vector<16x128xf32>
    %25 = arith.cmpf ogt, %4, %24 : vector<16x128xf32>
    %26 = arith.select %25, %18, %17 : vector<16x128xi1>, vector<16x128xf32>
    %27 = arith.mulf %26, %26 : vector<16x128xf32>
    %28 = arith.mulf %27, %23 : vector<16x128xf32>
    %c0_9 = arith.constant 0 : index
    %c0_10 = arith.constant 0 : index
    %29 = vector.load %arg4[%c0_9, %c0_10] : memref<8x128xf32, #tpu.memory_space<vmem>>, vector<8x128xf32>
    %30 = vector.shape_cast %28 : vector<16x128xf32> to vector<2x8x128xf32>
    %cst_11 = arith.constant dense<0.000000e+00> : vector<8x128xf32>
    %31 = vector.multi_reduction <add>, %30, %cst_11 [0] : vector<2x8x128xf32> to vector<8x128xf32>
    %32 = arith.addf %29, %31 : vector<8x128xf32>
    %c0_12 = arith.constant 0 : index
    %c0_13 = arith.constant 0 : index
    %33 = vector.load %arg4[%c0_12, %c0_13] : memref<8x128xf32, #tpu.memory_space<vmem>>, vector<8x128xf32>
    tpu.vector_store %arg4[%c0_12, %c0_13], %32 {strides = array<i32>} : memref<8x128xf32, #tpu.memory_space<vmem>>, vector<8x128xf32>,
    %c0_14 = arith.constant 0 : index
    %c0_15 = arith.constant 0 : index
    %34 = vector.load %arg5[%c0_14, %c0_15] : memref<8x128xf32, #tpu.memory_space<vmem>>, vector<8x128xf32>
    %35 = arith.mulf %17, %4 : vector<16x128xf32>
    %36 = vector.shape_cast %35 : vector<16x128xf32> to vector<2x8x128xf32>
    %cst_16 = arith.constant dense<0.000000e+00> : vector<8x128xf32>
    %37 = vector.multi_reduction <add>, %36, %cst_16 [0] : vector<2x8x128xf32> to vector<8x128xf32>
    %38 = arith.addf %34, %37 : vector<8x128xf32>
    %c0_17 = arith.constant 0 : index
    %c0_18 = arith.constant 0 : index
    %39 = vector.load %arg5[%c0_17, %c0_18] : memref<8x128xf32, #tpu.memory_space<vmem>>, vector<8x128xf32>
    tpu.vector_store %arg5[%c0_17, %c0_18], %38 {strides = array<i32>} : memref<8x128xf32, #tpu.memory_space<vmem>>, vector<8x128xf32>,
    %c0_19 = arith.constant 0 : index
    %c0_20 = arith.constant 0 : index
    %40 = vector.load %arg6[%c0_19, %c0_20] : memref<8x128xf32, #tpu.memory_space<vmem>>, vector<8x128xf32>
    %41 = arith.addf %17, %4 : vector<16x128xf32>
    %42 = vector.shape_cast %41 : vector<16x128xf32> to vector<2x8x128xf32>
    %cst_21 = arith.constant dense<0.000000e+00> : vector<8x128xf32>
    %43 = vector.multi_reduction <add>, %42, %cst_21 [0] : vector<2x8x128xf32> to vector<8x128xf32>
    %44 = arith.addf %40, %43 : vector<8x128xf32>
    %c0_22 = arith.constant 0 : index
    %c0_23 = arith.constant 0 : index
    %45 = vector.load %arg6[%c0_22, %c0_23] : memref<8x128xf32, #tpu.memory_space<vmem>>, vector<8x128xf32>
    tpu.vector_store %arg6[%c0_22, %c0_23], %44 {strides = array<i32>} : memref<8x128xf32, #tpu.memory_space<vmem>>, vector<8x128xf32>,
    return
  }
  func.func @transform_0(%arg0: i32, %arg1: i32) -> (i32, i32) {
    %c1_i32 = arith.constant 1 : i32
    %0 = arith.muli %arg0, %c1_i32 : i32
    %1 = arith.addi %0, %arg1 : i32
    %c0_i32 = arith.constant 0 : i32
    %c0_i32_0 = arith.constant 0 : i32
    return %1, %c0_i32 : i32, i32
  }
  func.func @transform_1(%arg0: i32, %arg1: i32) -> (i32, i32) {
    %c1_i32 = arith.constant 1 : i32
    %0 = arith.muli %arg0, %c1_i32 : i32
    %1 = arith.addi %0, %arg1 : i32
    %c0_i32 = arith.constant 0 : i32
    %c0_i32_0 = arith.constant 0 : i32
    return %1, %c0_i32 : i32, i32
  }
  func.func @transform_2(%arg0: i32, %arg1: i32) -> (i32, i32) {
    %c0_i32 = arith.constant 0 : i32
    %c0_i32_0 = arith.constant 0 : i32
    return %arg0, %c0_i32 : i32, i32
  }
  func.func @transform_3(%arg0: i32, %arg1: i32) -> (i32, i32) {
    %c0_i32 = arith.constant 0 : i32
    %c0_i32_0 = arith.constant 0 : i32
    return %arg0, %c0_i32 : i32, i32
  }
  func.func @transform_4(%arg0: i32, %arg1: i32) -> (i32, i32) {
    %c0_i32 = arith.constant 0 : i32
    %c0_i32_0 = arith.constant 0 : i32
    return %arg0, %c0_i32 : i32, i32
  }
}

</mosaic_0001>

<bundles_post_ra>
// kernel: tpu_custom_call.1
= control target key start
LH: loop header
LB: loop body
LE: loop exit
PB: predicated region body
PF: predicated region fallthrough
CT: control target
= control target key end

     0   :  { %10 = vsyncpa [#allocation3], 0  ;;  %s405_s0 = inlined_call_operand.hbm [shape: f32[16,128], index: 0, kind: input, shape index: {}]   ;;  %s406_s1 = inlined_call_operand.hbm [shape: f32[16,128], index: 1, kind: input, shape index: {}]   ;;  %s407_s2 = inlined_call_operand.hbm [shape: f32[8,128], index: 2, kind: output, shape index: {0}]   ;;  %s408_s3 = inlined_call_operand.hbm [shape: f32[8,128], index: 3, kind: output, shape index: {1}]   ;;  %s409_s4 = inlined_call_operand.hbm [shape: f32[8,128], index: 4, kind: output, shape index: {2}]  }
   0x1   :  { %11 = vsyncpa [#allocation6], 0 }
   0x2   :  { %12 = vsyncpa [#allocation4], 0 }
   0x3   :  { %13 = vsyncpa [#allocation9], 0  ;;  %s306_s15 = smov [#allocation2]   ;;  %s188_s19 = scalar_lea.hbm %s405_s0, 256 }
   0x4   :  { %s23_s16 = sshll.u32 %s306_s15, 4  ;;  %p189_p0 = scmp.ne.s32.totalorder %s405_s0, %s188_s19  ;;  %s24_s16 = int_to_ptr.vmem [resolvable:$true] %s23_s16 }
   0x5   :  { %p192_p1 = scmp.lt.u32.totalorder %s188_s19, %s405_s0 }
   0x7   :  { %p194_p2 = pnand %p192_p1, %p189_p0 }
   0x9   :  { %197 = shalt.err (!%p194_p2)
}
   0xa   :  { %s198_s24 = scalar_lea.vmem %s24_s16, 256  ;;  %p203_p4 = scmp.lt.s32.totalorder %s24_s16, %s24_s16 }
   0xb   :  { %p199_p3 = scmp.ne.s32.totalorder %s24_s16, %s198_s24  ;;  %p204_p5 = scmp.lt.s32.totalorder %s198_s24, %s198_s24 }
   0xd   :  { %p205_p6 = por %p204_p5, %p203_p4 }
   0xf   :  { %p206_p7 = pnand %p205_p6, %p199_p3 }
  0x11   :  { %209 = shalt.err (!%p206_p7)
}
  0x12   :  { %s307_s25 = smov 128   ;;  %s308_s26 = smov 8  }
  0x13   :  { %29 = dma.hbm_to_vmem [thread:$0]  %s405_s0, 256, %s24_s16, [#allocation3], %s307_s25, %s307_s25, %s308_s26  }
  0x14   :  { %s309_s29 = smov [#allocation5]   ;;  %s210_s7 = scalar_lea.hbm %s406_s1, 256 }
  0x15   :  { %s39_s30 = sshll.u32 %s309_s29, 4  ;;  %p211_p8 = scmp.ne.s32.totalorder %s406_s1, %s210_s7  ;;  %s40_s30 = int_to_ptr.vmem [resolvable:$true] %s39_s30 }
  0x16   :  { %p214_p9 = scmp.lt.u32.totalorder %s210_s7, %s406_s1 }
  0x18   :  { %p216_p10 = pnand %p214_p9, %p211_p8 }
  0x1a   :  { %219 = shalt.err (!%p216_p10)
}
  0x1b   :  { %s220_s12 = scalar_lea.vmem %s40_s30, 256  ;;  %p225_p12 = scmp.lt.s32.totalorder %s40_s30, %s40_s30 }
  0x1c   :  { %p221_p11 = scmp.ne.s32.totalorder %s40_s30, %s220_s12  ;;  %p226_p13 = scmp.lt.s32.totalorder %s220_s12, %s220_s12 }
  0x1e   :  { %p227_p0 = por %p226_p13, %p225_p12 }
  0x20   :  { %p228_p1 = pnand %p227_p0, %p221_p11 }
  0x22   :  { %231 = shalt.err (!%p228_p1)
}
  0x23   :  { %45 = dma.hbm_to_vmem [thread:$0]  %s406_s1, 256, %s40_s30, [#allocation6], %s307_s25, %s307_s25, %s308_s26  }
  0x24   :  { %298 = dma.done.wait [#allocation3], 256  }
  0x25   :  { %299 = vsyncadd [#allocation3], 4294967040 }
  0x26   :  { %300 = dma.done.wait [#allocation6], 256  }
  0x27   :  { %301 = vsyncadd [#allocation6], 4294967040  ;;  %v63_v0 = vld [vmem:[#allocation2] sm:$0xff]  ;;  %v64_v1 = vld [vmem:[#allocation2 + $0x8] sm:$0xff]  ;;  %s310_s1 = smov [#allocation8]   ;;  %s311_s15 = smov [#allocation7]  }
  0x28   :  { %v67_v2 = vand.u32 2147483647, %v63_v0  ;;  %v68_v3 = vand.u32 2147483647, %v64_v1  ;;  %v65_v12 = vld [vmem:[#allocation5] sm:$0xff]  ;;  %v66_v13 = vld [vmem:[#allocation5 + $0x8] sm:$0xff] }
  0x29   :  { %v93_v14 = vmax.f32 %v63_v0, 0.0  ;;  %v95_v15 = vmul.f32 %v65_v12, %v63_v0  ;;  %v94_v16 = vmax.f32 %v64_v1, 0.0  ;;  %v96_v17 = vmul.f32 %v66_v13, %v64_v1  ;;  %s141_s14 = sshll.u32 %s310_s1, 4  ;;  %s131_s16 = sshll.u32 %s311_s15, 4  ;;  %s142_s14 = int_to_ptr.vmem [resolvable:$true] %s141_s14  ;;  %s362_s16 = int_to_ptr.vmem [resolvable:$true] %s131_s16 }
  0x2a   :  { %v69_v4 = vsub.f32 0.0, %v67_v2  ;;  %v70_v5 = vsub.f32 0.0, %v68_v3  ;;  %vm87_vm0 = vcmp.ge.f32.partialorder %v63_v0, 0.0  ;;  %vm88_vm1 = vcmp.ge.f32.partialorder %v64_v1, 0.0  ;;  %s312_s17 = smov [#allocation10]   ;;  %s232_s19 = scalar_lea.vmem %s142_s14, 128 }
  0x2b   :  { %v97_v21 = vsub.f32 %v93_v14, %v95_v15  ;;  %v98_v24 = vsub.f32 %v94_v16, %v96_v17  ;;  %vm101_vm2 = vcmp.gt.f32.partialorder %v65_v12, 0.5  ;;  %vm102_vm3 = vcmp.gt.f32.partialorder %v66_v13, 0.5  ;;  %s151_s18 = sshll.u32 %s312_s17, 4  ;;  %p233_p2 = scmp.ne.s32.totalorder %s142_s14, %s232_s19  ;;  %s152_s18 = int_to_ptr.vmem [resolvable:$true] %s151_s18 }
  0x2c   :  { %v71_v6 = vmul.f32 1.442695, %v69_v4  ;;  %v73_v7 = vmul.f32 1.442695, %v70_v5  ;;  %p237_p3 = scmp.lt.s32.totalorder %s142_s14, %s142_s14  ;;  %p238_p4 = scmp.lt.s32.totalorder %s232_s19, %s232_s19 }
  0x2e   :  { %176 = vpow2.f32 %v71_v6  ;;  %p239_p5 = por %p238_p4, %p237_p3 }
  0x2f   :  { %178 = vpow2.f32 %v73_v7 }
  0x30   :  { %p240_p6 = pnand %p239_p5, %p233_p2 }
  0x38   :  { %v177_v8 = vpop.eup %176 }
  0x39   :  { %v179_v9 = vpop.eup %178  ;;  %v75_v10 = vadd.f32 1.0, %v177_v8 }
  0x3a   :  { %v76_v11 = vadd.f32 1.0, %v179_v9 }
  0x3b   :  { %180 = vrcp.f32 %v75_v10 }
  0x3c   :  { %182 = vrcp.f32 %v76_v11 }
  0x3d   :  { %184 = vlog2.f32 %v75_v10 }
  0x3e   :  { %186 = vlog2.f32 %v76_v11 }
  0x45   :  { %v181_v18 = vpop.eup %180 }
  0x46   :  { %v183_v19 = vpop.eup %182  ;;  %v85_v20 = vmul.f32 %v181_v18, %v177_v8 }
  0x47   :  { %v185_v22 = vpop.eup %184  ;;  %v86_v23 = vmul.f32 %v183_v19, %v179_v9 }
  0x48   :  { %v187_v25 = vpop.eup %186  ;;  %v89_v26 = vsel %vm87_vm0, %v181_v18, %v85_v20  ;;  %v78_v27 = vmul.f32 0.6931472, %v185_v22  ;;  %v91_v28 = vsel %vm87_vm0, %v85_v20, %v181_v18 }
  0x49   :  { %v90_v29 = vsel %vm88_vm1, %v183_v19, %v86_v23  ;;  %v114_v30 = vmul.f32 %v89_v26, %v65_v12  ;;  %v80_v31 = vmul.f32 0.6931472, %v187_v25  ;;  %v92_v32 = vsel %vm88_vm1, %v86_v23, %v183_v19 }
  0x4a   :  { %v115_v33 = vmul.f32 %v90_v29, %v66_v13  ;;  %v99_v34 = vadd.f32 %v97_v21, %v78_v27  ;;  %v103_v35 = vsel %vm101_vm2, %v91_v28, %v89_v26  ;;  %v104_v36 = vsel %vm102_vm3, %v92_v32, %v90_v29 }
  0x4b   :  { %v100_v37 = vadd.f32 %v98_v24, %v80_v31  ;;  %v105_v38 = vmul.f32 %v103_v35, %v103_v35  ;;  %v106_v39 = vmul.f32 %v104_v36, %v104_v36  ;;  %v120_v40 = vadd.f32 %v89_v26, %v65_v12 }
  0x4c   :  { %v116_v41 = vadd.f32 %v115_v33, %v114_v30  ;;  %v121_v42 = vadd.f32 %v90_v29, %v66_v13 }
  0x4d   :  { %v107_v43 = vmul.f32 %v105_v38, %v99_v34  ;;  %v108_v44 = vmul.f32 %v106_v39, %v100_v37 }
  0x4e   :  { %v122_v45 = vadd.f32 %v121_v42, %v120_v40  ;;  %118 = vst [vmem:[#allocation8] sm:$0xff] %v116_v41 }
  0x4f   :  { %v110_v46 = vadd.f32 %v108_v44, %v107_v43 }
  0x50   :  { %243 = shalt.err (!%p240_p6)
}
  0x51   :  { %s244_s22 = scalar_lea.hbm %s408_s3, 128 }
  0x52   :  { %p245_p7 = scmp.ne.s32.totalorder %s408_s3, %s244_s22  ;;  %p248_p8 = scmp.lt.u32.totalorder %s244_s22, %s408_s3 }
  0x54   :  { %p250_p9 = pnand %p248_p8, %p245_p7 }
  0x56   :  { %253 = shalt.err (!%p250_p9)
}
  0x57   :  { %144 = dma.vmem_to_hbm [thread:$0]  %s142_s14, 128, %s408_s3, [#allocation9]   ;;  %124 = vst [vmem:[#allocation10] sm:$0xff] %v122_v45  ;;  %112 = vst [vmem:[#allocation7] sm:$0xff] %v110_v46 }
  0x58   :  { %s254_s29 = scalar_lea.vmem %s152_s18, 128  ;;  %p259_p11 = scmp.lt.s32.totalorder %s152_s18, %s152_s18 }
  0x59   :  { %p255_p10 = scmp.ne.s32.totalorder %s152_s18, %s254_s29  ;;  %p260_p12 = scmp.lt.s32.totalorder %s254_s29, %s254_s29 }
  0x5b   :  { %p261_p13 = por %p260_p12, %p259_p11 }
  0x5d   :  { %p262_p0 = pnand %p261_p13, %p255_p10 }
  0x5f   :  { %265 = shalt.err (!%p262_p0)
}
  0x60   :  { %s266_s6 = scalar_lea.hbm %s409_s4, 128 }
  0x61   :  { %p267_p1 = scmp.ne.s32.totalorder %s409_s4, %s266_s6  ;;  %p270_p2 = scmp.lt.u32.totalorder %s266_s6, %s409_s4 }
  0x63   :  { %p272_p3 = pnand %p270_p2, %p267_p1 }
  0x65   :  { %275 = shalt.err (!%p272_p3)
}
  0x66   :  { %154 = dma.vmem_to_hbm [thread:$0]  %s152_s18, 128, %s409_s4, [#allocation9]  }
  0x67   :  { %s276_s12 = scalar_lea.vmem %s362_s16, 128  ;;  %p281_p5 = scmp.lt.s32.totalorder %s362_s16, %s362_s16 }
  0x68   :  { %p277_p4 = scmp.ne.s32.totalorder %s362_s16, %s276_s12  ;;  %p282_p6 = scmp.lt.s32.totalorder %s276_s12, %s276_s12 }
  0x6a   :  { %p283_p7 = por %p282_p6, %p281_p5 }
  0x6c   :  { %p284_p8 = pnand %p283_p7, %p277_p4 }
  0x6e   :  { %287 = shalt.err (!%p284_p8)
}
  0x6f   :  { %s288_s1 = scalar_lea.hbm %s407_s2, 128 }
  0x70   :  { %p289_p9 = scmp.ne.s32.totalorder %s407_s2, %s288_s1  ;;  %p292_p10 = scmp.lt.u32.totalorder %s288_s1, %s407_s2 }
  0x72   :  { %p294_p11 = pnand %p292_p10, %p289_p9 }
  0x74   :  { %297 = shalt.err (!%p294_p11)
}
  0x75   :  { %134 = dma.vmem_to_hbm [thread:$0]  %s362_s16, 128, %s407_s2, [#allocation4]  }
  0x76   :  { %302 = dma.done.wait [#allocation4], 128  }
  0x77   :  { %303 = vsyncadd [#allocation4], 4294967168 }
  0x78   :  { %304 = dma.done.wait [#allocation9], 256  }
  0x79   :  { %305 = vsyncadd [#allocation9], 4294967040 }
  0x7a   :  { %164 = vsyncpa [#allocation3], 1 }
  0x7b   :  { %165 = vsyncpa [#allocation6], 1 }
  0x7c   :  { %166 = vsyncpa [#allocation4], 1 }
  0x7d   :  { %167 = vsyncpa [#allocation9], 1 }

</bundles_post_ra>
